<compile_context>
chip_gen: v5e
topology: v5e:2x2
jax: 0.10.0
libtpu: 0.0.40
codegen_flags: <defaults>
</compile_context>

<pallas_src>
import functools

import jax
import jax.numpy as jnp
from jax.experimental import pallas as pl
from jax.experimental.pallas import tpu as pltpu


def _cdiv(a, b):
    return -(-a // b)


def se_kernel(x_ref, w1_ref, w2_ref, o_ref, acc_ref, *, inv_hw, thw, rem, tlane):
    """grid = (B_tiles, HW_chunks).

    x_ref:  (TB, C, THW) streamed chunk     w1_ref: (C, R)     w2_ref: (R, C)
    o_ref:  (TB, 1, C)                      acc_ref: (TB, C, TLANE) or (TB, C) f32
    """
    k = pl.program_id(1)
    nk = pl.num_programs(1)

    @pl.when(k == 0)
    def _init():
        acc_ref[...] = jnp.zeros_like(acc_ref)

    def partial_sum(x):
        # f32 partial sum of one chunk, shaped like acc_ref[...]
        if tlane:
            # Lane-preserving accumulation: pure VPU adds of 128-lane-aligned
            # static slices; the cross-lane reduce is deferred to finalize.
            part = x[:, :, 0:tlane].astype(jnp.float32)
            for j in range(1, thw // tlane):
                part = part + x[:, :, j * tlane:(j + 1) * tlane].astype(jnp.float32)
            return part
        return jnp.sum(x, axis=-1, dtype=jnp.float32)

    if rem:
        # hw % thw != 0: the tail of the last chunk reads out-of-range (unspecified)
        # data -> mask it to zero before accumulating.
        @pl.when(k < nk - 1)
        def _full_chunk():
            acc_ref[...] += partial_sum(x_ref[...])

        @pl.when(k == nk - 1)
        def _tail_chunk():
            x = x_ref[...]
            lane = jax.lax.broadcasted_iota(jnp.int32, x.shape, x.ndim - 1)
            x = jnp.where(lane < rem, x, jnp.zeros_like(x))
            acc_ref[...] += partial_sum(x)
    else:
        acc_ref[...] += partial_sum(x_ref[...])

    @pl.when(k == nk - 1)
    def _finalize():
        pooled = acc_ref[...]
        if tlane:
            pooled = jnp.sum(pooled, axis=-1)          # one cross-lane reduce per B tile
        y = pooled * inv_hw                            # (TB, C) global average pool
        h = jnp.dot(y.astype(w1_ref.dtype), w1_ref[...],
                    preferred_element_type=jnp.float32)
        h = jnp.maximum(h, 0.0)                        # ReLU
        z = jnp.dot(h.astype(w2_ref.dtype), w2_ref[...],
                    preferred_element_type=jnp.float32)
        gate = 1.0 / (1.0 + jnp.exp(-z))               # Sigmoid
        o_ref[...] = gate[:, None, :].astype(o_ref.dtype)


def se_forward(x, w1, w2, *, target_block_bytes=4 << 20, max_block_b=64):
    """SE forward. x: (B, C, H, W).  w1: fc1.weight (R, C).  w2: fc2.weight (C, R).
    Returns the sigmoid gate with shape (B, C, 1, 1)."""
    b, c, h, w = x.shape
    r = w1.shape[0]
    assert w1.shape == (r, c) and w2.shape == (c, r)
    hw = h * w
    itemsize = x.dtype.itemsize

    x_flat = x.reshape(b, c, hw)
    w1t = jnp.transpose(w1)      # (C, R): pooled @ w1t
    w2t = jnp.transpose(w2)      # (R, C): hidden @ w2t

    # ---- tile sizing (no padding of x) ----------------------------------
    # B tile: >= 2 tiles whenever B >= 2 so the 'parallel' axis can shard across
    # both TensorCores on v7x; tb is a leading (unconstrained) block dim.
    tb = 1 if b < 2 else min(max_block_b, _cdiv(b, 2))
    n_b = _cdiv(b, tb)

    # HW chunk: either the full spatial extent (single chunk, no lane-alignment
    # requirement since it equals the array dim) or a 512-lane multiple sized
    # toward target_block_bytes.
    row_bytes = max(tb * c * itemsize, 1)
    thw_target = max(512, target_block_bytes // row_bytes)
    if hw <= thw_target:
        thw = hw
    else:
        thw = max(512, (thw_target // 512) * 512)
    n_k = _cdiv(hw, thw)
    rem = hw % thw if n_k > 1 else 0

    # Lane-preserving accumulator width (deferred cross-lane reduce); fall back to
    # a (tb, c) accumulator if the scratch would be too large or chunking is trivial.
    tlane = 0
    if n_k > 1:
        tlane = 512
        while tlane > 128 and tb * c * tlane * 4 > (2 << 20):
            tlane //= 2
        if tb * c * tlane * 4 > (2 << 20) or thw % tlane:
            tlane = 0
    acc_shape = (tb, c, tlane) if tlane else (tb, c)

    # ---- VMEM budget / compiler params -----------------------------------
    x_block = tb * c * thw * itemsize
    w_bytes = 2 * c * r * w1.dtype.itemsize
    acc_bytes = tb * c * max(tlane, 1) * 4
    out_block = tb * c * itemsize
    needed = 2 * x_block + 2 * w_bytes + acc_bytes + 2 * out_block
    vmem_limit = int(min(64 << 20, max(32 << 20, needed + (8 << 20))))

    inv_hw = 1.0 / float(hw)
    kernel = functools.partial(se_kernel, inv_hw=inv_hw, thw=thw, rem=rem, tlane=tlane)

    gate = pl.pallas_call(
        kernel,
        out_shape=jax.ShapeDtypeStruct((b, 1, c), x.dtype),
        grid_spec=pltpu.PrefetchScalarGridSpec(
            num_scalar_prefetch=0,
            grid=(n_b, n_k),
            in_specs=[
                # streamed x chunks (double-buffered by BlockSpec pipelining)
                pl.BlockSpec((tb, c, thw), lambda i, k: (i, 0, k)),
                # weights: constant block index -> VMEM-resident across the grid
                pl.BlockSpec((c, r), lambda i, k: (0, 0)),
                pl.BlockSpec((r, c), lambda i, k: (0, 0)),
            ],
            out_specs=pl.BlockSpec((tb, 1, c), lambda i, k: (i, 0, 0)),
            scratch_shapes=[pltpu.VMEM(acc_shape, jnp.float32)],
        ),
        compiler_params=pltpu.CompilerParams(
            dimension_semantics=("parallel", "arbitrary"),
            vmem_limit_bytes=vmem_limit,
        ),
    )(x_flat, w1t, w2t)

    return gate.reshape(b, c, 1, 1)


def _reference(x, w1, w2):
    b, c = x.shape[:2]
    y = jnp.mean(x.astype(jnp.float32), axis=(2, 3))           # GAP -> (B, C)
    h = jnp.maximum(y @ w1.T.astype(jnp.float32), 0.0)         # Linear(C->R), ReLU
    z = jax.nn.sigmoid(h @ w2.T.astype(jnp.float32))           # Linear(R->C), Sigmoid
    return z.astype(x.dtype).reshape(b, c, 1, 1)


if __name__ == "__main__":
    key = jax.random.PRNGKey(0)

    # Case 1: small inference-style shape (single HW chunk, two B tiles of 1).
    B, C, H, W, RATIO = 2, 32, 16, 16, 8
    kx, k1, k2, key = jax.random.split(key, 4)
    x = jax.random.normal(kx, (B, C, H, W), dtype=jnp.float32)
    w1 = jax.random.normal(k1, (RATIO, C), dtype=jnp.float32) * 0.1   # fc1.weight
    w2 = jax.random.normal(k2, (C, RATIO), dtype=jnp.float32) * 0.1   # fc2.weight

    out = jax.block_until_ready(se_forward(x, w1, w2))
    ref = _reference(x, w1, w2)
    assert out.shape == (B, C, 1, 1)
    assert jnp.allclose(out, ref, atol=1e-5, rtol=1e-5), float(jnp.max(jnp.abs(out - ref)))

    # Case 2: exercise the multi-chunk streaming path (masked spatial tail,
    # partial B tile) by forcing a small per-step block budget.
    B2, C2, H2, W2, R2 = 3, 16, 40, 40, 4
    kx, k1, k2, key = jax.random.split(key, 4)
    x2 = jax.random.normal(kx, (B2, C2, H2, W2), dtype=jnp.float32)
    w1b = jax.random.normal(k1, (R2, C2), dtype=jnp.float32) * 0.1
    w2b = jax.random.normal(k2, (C2, R2), dtype=jnp.float32) * 0.1

    out2 = jax.block_until_ready(se_forward(x2, w1b, w2b, target_block_bytes=64 * 1024))
    ref2 = _reference(x2, w1b, w2b)
    assert out2.shape == (B2, C2, 1, 1)
    assert jnp.allclose(out2, ref2, atol=1e-5, rtol=1e-5), float(jnp.max(jnp.abs(out2 - ref2)))

    print("KERNEL_OK")
</pallas_src>

<mosaic_0001>
module attributes {stable_mosaic.version = 11 : i64} {
  func.func @se_kernel(%arg0: i32, %arg1: i32, %arg2: memref<1x32x256xf32, #tpu.memory_space<vmem>>, %arg3: memref<32x8xf32, #tpu.memory_space<vmem>>, %arg4: memref<8x32xf32, #tpu.memory_space<vmem>>, %arg5: memref<1x1x32xf32, #tpu.memory_space<vmem>>, %arg6: memref<1x32xf32, #tpu.memory_space<vmem>>) attributes {dimension_semantics = [#tpu.dimension_semantics<parallel>, #tpu.dimension_semantics<arbitrary>], iteration_bounds = array<i64: 2, 1>, scalar_prefetch = 0 : i64, scratch_operands = 1 : i64, tpu.core_type = #tpu.core_type<tc>, window_params = [{transform_indices = @transform_0, window_bounds = array<i64: 1, 32, 256>}, {pipeline_mode = #tpu.pipeline_mode<synchronous>, transform_indices = @transform_1, window_bounds = array<i64: 32, 8>}, {pipeline_mode = #tpu.pipeline_mode<synchronous>, transform_indices = @transform_2, window_bounds = array<i64: 8, 32>}, {transform_indices = @transform_3, window_bounds = array<i64: 1, 1, 32>}]} {
    %c0_i32 = arith.constant 0 : i32
    %0 = arith.cmpi eq, %arg1, %c0_i32 : i32
    %1 = arith.extui %0 : i1 to i32
    %c0_i32_0 = arith.constant 0 : i32
    %2 = arith.cmpi ne, %1, %c0_i32_0 : i32
    scf.if %2 {
      %cst_9 = arith.constant 0.000000e+00 : f32
      %11 = vector.broadcast %cst_9 : f32 to vector<1x32xf32>
      %c0_10 = arith.constant 0 : index
      %c0_11 = arith.constant 0 : index
      %12 = vector.load %arg6[%c0_10, %c0_11] : memref<1x32xf32, #tpu.memory_space<vmem>>, vector<1x32xf32>
      tpu.vector_store %arg6[%c0_10, %c0_11], %11 {strides = array<i32>} : memref<1x32xf32, #tpu.memory_space<vmem>>, vector<1x32xf32>,
    } else {
    }
    %c0 = arith.constant 0 : index
    %c0_1 = arith.constant 0 : index
    %3 = vector.load %arg6[%c0, %c0_1] : memref<1x32xf32, #tpu.memory_space<vmem>>, vector<1x32xf32>
    %c0_2 = arith.constant 0 : index
    %c0_3 = arith.constant 0 : index
    %c0_4 = arith.constant 0 : index
    %4 = vector.load %arg2[%c0_2, %c0_3, %c0_4] : memref<1x32x256xf32, #tpu.memory_space<vmem>>, vector<1x32x256xf32>
    %cst = arith.constant dense<0.000000e+00> : vector<1x32xf32>
    %5 = vector.multi_reduction <add>, %4, %cst [2] : vector<1x32x256xf32> to vector<1x32xf32>
    %6 = arith.addf %3, %5 : vector<1x32xf32>
    %c0_5 = arith.constant 0 : index
    %c0_6 = arith.constant 0 : index
    %7 = vector.load %arg6[%c0_5, %c0_6] : memref<1x32xf32, #tpu.memory_space<vmem>>, vector<1x32xf32>
    tpu.vector_store %arg6[%c0_5, %c0_6], %6 {strides = array<i32>} : memref<1x32xf32, #tpu.memory_space<vmem>>, vector<1x32xf32>,
    %c0_i32_7 = arith.constant 0 : i32
    %8 = arith.cmpi eq, %arg1, %c0_i32_7 : i32
    %9 = arith.extui %8 : i1 to i32
    %c0_i32_8 = arith.constant 0 : i32
    %10 = arith.cmpi ne, %9, %c0_i32_8 : i32
    scf.if %10 {
      %c0_9 = arith.constant 0 : index
      %c0_10 = arith.constant 0 : index
      %11 = vector.load %arg6[%c0_9, %c0_10] : memref<1x32xf32, #tpu.memory_space<vmem>>, vector<1x32xf32>
      %cst_11 = arith.constant 3.906250e-03 : f32
      %12 = vector.broadcast %cst_11 : f32 to vector<1x32xf32>
      %13 = arith.mulf %11, %12 : vector<1x32xf32>
      %c0_12 = arith.constant 0 : index
      %c0_13 = arith.constant 0 : index
      %14 = vector.load %arg3[%c0_12, %c0_13] : memref<32x8xf32, #tpu.memory_space<vmem>>, vector<32x8xf32>
      %cst_14 = arith.constant dense<0.000000e+00> : vector<1x8xf32>
      %15 = tpu.matmul %13, %14, %cst_14 {dimension_numbers = #tpu.dot_dimension_numbers<[1], [0], [0], [1], [0, 0, 1, 1], [], []>} : vector<1x32xf32>, vector<32x8xf32>, vector<1x8xf32> -> vector<1x8xf32>
      %cst_15 = arith.constant 0.000000e+00 : f32
      %16 = vector.broadcast %cst_15 : f32 to vector<1x8xf32>
      %17 = arith.maximumf %15, %16 : vector<1x8xf32>
      %c0_16 = arith.constant 0 : index
      %c0_17 = arith.constant 0 : index
      %18 = vector.load %arg4[%c0_16, %c0_17] : memref<8x32xf32, #tpu.memory_space<vmem>>, vector<8x32xf32>
      %cst_18 = arith.constant dense<0.000000e+00> : vector<1x32xf32>
      %19 = tpu.matmul %17, %18, %cst_18 {dimension_numbers = #tpu.dot_dimension_numbers<[1], [0], [0], [1], [0, 0, 1, 1], [], []>} : vector<1x8xf32>, vector<8x32xf32>, vector<1x32xf32> -> vector<1x32xf32>
      %cst_19 = arith.constant 0.000000e+00 : f32
      %20 = vector.broadcast %cst_19 : f32 to vector<1x32xf32>
      %21 = arith.subf %20, %19 : vector<1x32xf32>
      %22 = math.exp %21 : vector<1x32xf32>
      %cst_20 = arith.constant 1.000000e+00 : f32
      %23 = vector.broadcast %cst_20 : f32 to vector<1x32xf32>
      %24 = arith.addf %23, %22 : vector<1x32xf32>
      %cst_21 = arith.constant 1.000000e+00 : f32
      %25 = vector.broadcast %cst_21 : f32 to vector<1x32xf32>
      %26 = arith.divf %25, %24 : vector<1x32xf32>
      %27 = vector.shape_cast %26 : vector<1x32xf32> to vector<1x1x32xf32>
      %c0_22 = arith.constant 0 : index
      %c0_23 = arith.constant 0 : index
      %c0_24 = arith.constant 0 : index
      %28 = vector.load %arg5[%c0_22, %c0_23, %c0_24] : memref<1x1x32xf32, #tpu.memory_space<vmem>>, vector<1x1x32xf32>
      tpu.vector_store %arg5[%c0_22, %c0_23, %c0_24], %27 {strides = array<i32>} : memref<1x1x32xf32, #tpu.memory_space<vmem>>, vector<1x1x32xf32>,
    } else {
    }
    return
  }
  func.func @transform_0(%arg0: i32, %arg1: i32) -> (i32, i32, i32) {
    %c0_i32 = arith.constant 0 : i32
    %c0_i32_0 = arith.constant 0 : i32
    return %arg0, %c0_i32, %arg1 : i32, i32, i32
  }
  func.func @transform_1(%arg0: i32, %arg1: i32) -> (i32, i32) {
    %c0_i32 = arith.constant 0 : i32
    %c0_i32_0 = arith.constant 0 : i32
    %c0_i32_1 = arith.constant 0 : i32
    return %c0_i32, %c0_i32_0 : i32, i32
  }
  func.func @transform_2(%arg0: i32, %arg1: i32) -> (i32, i32) {
    %c0_i32 = arith.constant 0 : i32
    %c0_i32_0 = arith.constant 0 : i32
    %c0_i32_1 = arith.constant 0 : i32
    return %c0_i32, %c0_i32_0 : i32, i32
  }
  func.func @transform_3(%arg0: i32, %arg1: i32) -> (i32, i32, i32) {
    %c0_i32 = arith.constant 0 : i32
    %c0_i32_0 = arith.constant 0 : i32
    %c0_i32_1 = arith.constant 0 : i32
    return %arg0, %c0_i32, %c0_i32_0 : i32, i32, i32
  }
}

</mosaic_0001>

<bundles_post_ra>
// kernel: tpu_custom_call.1
= control target key start
LH: loop header
LB: loop body
LE: loop exit
PB: predicated region body
PF: predicated region fallthrough
CT: control target
= control target key end

     0   :  { %8 = vsyncpa [#allocation4], 0  ;;  %s877_s0 = inlined_call_operand.hbm [shape: f32[2,32,256], index: 0, kind: input, shape index: {}]   ;;  %s878_s1 = inlined_call_operand.vmem [shape: f32[32,8], index: 1, kind: input, shape index: {}]   ;;  %s879_s2 = inlined_call_operand.vmem [shape: f32[8,32], index: 2, kind: input, shape index: {}]   ;;  %s880_s3 = inlined_call_operand.hbm [shape: f32[2,1,32], index: 3, kind: output, shape index: {}]  }
   0x1   :  { %10 = vsyncpa [#allocation4 + $0x1], 0 }
   0x2   :  { %11 = vsyncpa [#allocation5], 0 }
   0x3   :  { %13 = vsyncpa [#allocation5 + $0x1], 0  ;;  %s738_s12 = smov 0   ;;  %s740_s13 = smov 0  }
   0x4   :  { %s742_s14 = smov 0   ;;  %s744_s15 = smov 0  }
   0x5   :  { %s746_s16 = smov 0   ;;  %s748_s17 = smov 0  }
   0x6 LB: > { %s513_s18 = sadd.s32 4294967295, %s712_s17   ;;  %s514_s19 = sadd.s32 4294967294, %s712_s17   ;;  %s712_s17 = sphi %s748_s17, %s19_s17   ;;  %s708_s16 = sphi %s746_s16, %s889_s16   ;;  %s704_s15 = sphi %s744_s15, %s888_s15   ;;  %s700_s14 = sphi %s742_s14, %s887_s14   ;;  %s696_s13 = sphi %s740_s13, %s886_s13   ;;  %s692_s12 = sphi %s738_s12, %s885_s12  }
   0x7   : > { %s31_s20 = sadd.s32 1, %s708_s16  ;;  %s40_s21 = sadd.s32 1, %s700_s14 }
   0x8   : > { %p33_p0 = scmp.ge.s32.totalorder %s31_s20, 2  ;;  %p47_p1 = scmp.ne.s32.totalorder %s700_s14, %s696_s13 }
   0x9   : > { %p48_p2 = scmp.eq.s32.totalorder %s712_s17, 0  ;;  %p53_p3 = scmp.ne.s32.totalorder %s696_s13, %s692_s12 }
   0xa   : > { %s891_s20 = smov (%p33_p0, %s31_s20), 0  ;;  %p54_p5 = scmp.eq.s32.totalorder %s513_s18, 0 }
   0xb   : > { %p779_p4 = por %p48_p2, %p47_p1  ;;  %s35_s23 = ssub.s32 %s708_s16, %s891_s20 }
   0xc   : > { %p119_p6 = scmp.eq.s32.totalorder %s513_s18, 1  ;;  %p38_p7 = scmp.eq.s32.totalorder %s35_s23, 0 }
   0xd   : > { %p785_p8 = por %p54_p5, %p53_p3  ;;  %p125_p10 = scmp.eq.s32.totalorder %s514_s19, 1 }
   0xe   : > { %p789_p9 = por %p119_p6, %p47_p1  ;;  %p516_p12 = scmp.ge.s32.totalorder %s712_s17, 2 }
   0xf   : > { %s794_s26 = scalar_select %p38_p7, %s700_s14, %s40_s21  }
  0x10   : > { %p796_p11 = por %p125_p10, %p53_p3  ;;  %p539_p13 = scmp.lt.s32.totalorder %s712_s17, 2 }
  0x11   : > { %s151_s28 = sand.u32 1, %s700_s14   ;;  %s526_s30 = sshll.u32 %s708_s16, 6 }
  0x12   : > { %s517_s29 = sshll.u32 %s151_s28, 6  ;;  %s162_s6 = scalar_lea.hbm %s877_s0, %s526_s30 }
  0x13   : > { %s155_s7 = scalar_lea.vmem [#allocation3], %s517_s29  ;;  %s163_s9 = sshll.u32 %s162_s6, 4  ;;  %s164_s9 = int_to_ptr.hbm [resolvable:$true] %s163_s9 }
  0x14   : > { %s165_s8 = sshll.u32 %s155_s7, 4  ;;  %p532_p0 = pnand %p539_p13, %p779_p4  ;;  %s166_s8 = int_to_ptr.vmem [resolvable:$true] %s165_s8 }
  0x15   : > { %p520_p1 = scmp.ge.s32.totalorder %s712_s17, 1  ;;  %s152_s10 = scalar_lea.sflag [#allocation4], %s151_s28 }
  0x16   : > { %s714_s11 = smov 256   ;;  %s715_s18 = smov 16  }
  0x17   : > { %534 = dma.hbm_to_vmem [thread:$0]  (!%p532_p0), %s164_s9, 1024, %s166_s8, %s152_s10, %s714_s11, %s714_s11, %s715_s18  }
  0x18   : > { %p173_p2 = scmp.lt.s32.totalorder %s712_s17, 3 }
  0x1a   : > { %p174_p3 = pnand %p520_p1, %p173_p2 }
  0x1b   : > { %s812_s19 = sand.u32 (!%p174_p3), 1, %s696_s13  }
  0x1c   : > { %177 = sbr.rel (%p174_p3) target bundleno = 632 (0x278), region = 32  ;;  %s521_s21 = sshll.u32 (!%p174_p3), %s812_s19, 6 }
  0x1d   : > { %s180_s23 = scalar_lea.sflag (!%p174_p3), [#allocation4], %s812_s19  ;;  %s183_s29 = scalar_lea.vmem (!%p174_p3), [#allocation3], %s521_s21 }
  0x21   : > { %683 = dma.done.wait (%p785_p8), %s180_s23, 1024  }
  0x22   : > { %685 = vsyncadd (%p785_p8), %s180_s23, 4294966272  ;;  %v214_v0 = vld [vmem:[%s183_s29] sm:$0xff]  ;;  %v215_v1 = vld [vmem:[%s183_s29 + $0x8] sm:$0xff]  ;;  %v716_v12 = vmov 0   ;;  %vm211_vm0 = vcmask 253952   ;;  %v717_v53 = vmov 0.0   ;;  %v325_v59 = vlaneseq  ;;  %s432_s18 = scalar_lea.hbm %s880_s3, %s704_s15 }
  0x23   : > { %v222_v2 = vadd.f32 %v215_v1, %v214_v0  ;;  %v218_v3 = vld [vmem:[%s183_s29 + $0x20] sm:$0xff]  ;;  %v219_v4 = vld [vmem:[%s183_s29 + $0x28] sm:$0xff]  ;;  %v216_v6 = vld [vmem:[%s183_s29 + $0x10] sm:$0xff]  ;;  %593 = vset.pattern.permute.xlu2 %v716_v12  ;;  %594 = vset.pattern.permute.xlu0 %v716_v12  ;;  %212 = vst.msk [vmem:[#allocation2] sm:$0x1] %vm211_vm0, %v717_v53  ;;  %vm330_vm1 = vcmask 130112  }
  0x24   : > { %v228_v5 = vadd.f32 %v219_v4, %v218_v3  ;;  %v217_v7 = vld [vmem:[%s183_s29 + $0x18] sm:$0xff]  ;;  %v220_v8 = vld [vmem:[%s183_s29 + $0x30] sm:$0xff]  ;;  %595 = vset.pattern.permute.xlu1 %v716_v12  ;;  %v351_v55 = vld [vmem:[%s878_s1 + $0x10] sm:$0xff]  ;;  %v326_v60 = vand.u32 127, %v325_v59  ;;  %vm334_vm2 = vcmask 195712   ;;  %vm338_vm3 = vcmask 261312  }
  0x25   : > { %223 = vadd.xlane.f32.xlu0 %v222_v2  ;;  %v221_v9 = vld [vmem:[%s183_s29 + $0x38] sm:$0xff]  ;;  %v225_v10 = vadd.f32 %v217_v7, %v216_v6  ;;  %v352_v54 = vld [vmem:[%s878_s1 + $0x18] sm:$0xff]  ;;  %vm353_vm4 = vcmask 261120   ;;  %vm379_vm5 = vcmask 64512   ;;  %s205_s21 = scalar_lea.vmem [#allocation6], %s812_s19  ;;  %s436_s29 = sshll.u32 %s432_s18, 4  ;;  %s437_s29 = int_to_ptr.hbm [resolvable:$true] %s436_s29 }
  0x26   : > { %229 = vadd.xlane.f32.xlu1 %v228_v5  ;;  %v231_v11 = vadd.f32 %v221_v9, %v220_v8  ;;  %369 = vmatpush.msra.mxu0 %v352_v54  ;;  %v350_v56 = vld [vmem:[%s878_s1 + $0x8] sm:$0xff]  ;;  %v349_v57 = vld [vmem:[%s878_s1] sm:$0xff]  ;;  %v328_v61 = vadd.s32 4294967288, %v326_v60  ;;  %v332_v63 = vadd.s32 4294967280, %v326_v60  ;;  %v336_v2 = vadd.s32 4294967272, %v326_v60  ;;  %s434_s23 = sshll.u32 %s205_s21, 4  ;;  %s435_s23 = int_to_ptr.vmem [resolvable:$true] %s434_s23 }
  0x27   : > { %s424_s15 = scalar_lea.sflag [#allocation5], %s812_s19  ;;  %s644_s22 = sshra.s32 %s437_s29, 4  ;;  %s645_s22 = int_to_ptr.hbm [resolvable:$true] %s644_s22 }
  0x28   : > { %370 = vmatpush.msra.mxu0 %v351_v55  ;;  %s646_s24 = scalar_lea.hbm %s645_s22, 1  ;;  %s650_s4 = scalar_lea.hbm %s880_s3, 2 }
  0x29   : > { %p647_p4 = scmp.ne.s32.totalorder %s645_s22, %s646_s24  ;;  %p651_p7 = scmp.lt.s32.totalorder %s645_s22, %s880_s3 }
  0x2a   : > { %371 = vmatpush.msra.mxu0 %v350_v56  ;;  %v213_v7 = vld [vmem:[#allocation2] sm:$0x1]  ;;  %p652_p8 = scmp.lt.s32.totalorder %s650_s4, %s646_s24 }
  0x2b   : > { %p648_p5 = pnand %p647_p4, %p789_p9 }
  0x2c   : > { %372 = vmatpush.msra.mxu0 %v349_v57  ;;  %p653_p10 = por %p652_p8, %p651_p7 }
  0x2d   : > { %226 = vadd.xlane.f32.xlu0 %v225_v10  ;;  %p649_p6 = pneg %p648_p5 }
  0x2e   : > { %232 = vadd.xlane.f32.xlu1 %v231_v11 }
  0x2f   : > { %p654_p13 = pnand %p653_p10, %p649_p6 }
  0x98   : > { %v224_v13 = vpop.xlane.xlu0 %223 }
  0x99   : > { %v238_v14 = vperm.slane %v224_v13, 0  ;;  %v239_v15 = vperm.slane %v224_v13, 1  ;;  %v240_v16 = vperm.slane %v224_v13, 2  ;;  %v241_v17 = vperm.slane %v224_v13, 3  ;;  %v230_v32 = vpop.xlane.xlu1 %229 }
  0x9a   : > { %v242_v18 = vperm.slane %v224_v13, 4  ;;  %v243_v19 = vperm.slane %v224_v13, 5  ;;  %v244_v20 = vperm.slane %v224_v13, 6  ;;  %v245_v21 = vperm.slane %v224_v13, 7 }
  0x9b   : > { %270 = vst [vmem:[#allocation1] ss:$9 sm:$0xff] %v238_v14  ;;  %v254_v33 = vperm.slane %v230_v32, 0  ;;  %v255_v34 = vperm.slane %v230_v32, 1  ;;  %v256_v35 = vperm.slane %v230_v32, 2  ;;  %v257_v37 = vperm.slane %v230_v32, 3 }
  0x9c   : > { %272 = vst [vmem:[#allocation1 + $0x1] ss:$9 sm:$0xff] %v239_v15  ;;  %v258_v38 = vperm.slane %v230_v32, 4  ;;  %v259_v39 = vperm.slane %v230_v32, 5  ;;  %v260_v40 = vperm.slane %v230_v32, 6  ;;  %v261_v41 = vperm.slane %v230_v32, 7 }
  0x9d   : > { %274 = vst [vmem:[#allocation1 + $0x2] ss:$9 sm:$0xff] %v240_v16  ;;  %v378_v14 = vld [vmem:[%s879_s2] sm:$0xff] }
  0x9e   : > { %276 = vst [vmem:[#allocation1 + $0x3] ss:$9 sm:$0xff] %v241_v17  ;;  %398 = vmatpush.msra.mxu1 %v378_v14 }
  0x9f   : > { %278 = vst [vmem:[#allocation1 + $0x4] ss:$9 sm:$0xff] %v242_v18 }
  0xa0   : > { %280 = vst [vmem:[#allocation1 + $0x5] ss:$9 sm:$0xff] %v243_v19  ;;  %v227_v22 = vpop.xlane.xlu0 %226 }
  0xa1   : > { %282 = vst [vmem:[#allocation1 + $0x6] ss:$9 sm:$0xff] %v244_v20  ;;  %v246_v23 = vperm.slane %v227_v22, 0  ;;  %v247_v24 = vperm.slane %v227_v22, 1  ;;  %v248_v25 = vperm.slane %v227_v22, 2  ;;  %v249_v27 = vperm.slane %v227_v22, 3  ;;  %v233_v42 = vpop.xlane.xlu1 %232 }
  0xa2   : > { %284 = vst [vmem:[#allocation1 + $0x7] ss:$9 sm:$0xff] %v245_v21  ;;  %v250_v28 = vperm.slane %v227_v22, 4  ;;  %v251_v29 = vperm.slane %v227_v22, 5  ;;  %v252_v30 = vperm.slane %v227_v22, 6  ;;  %v253_v31 = vperm.slane %v227_v22, 7 }
  0xa3   : > { %v262_v43 = vperm.slane %v233_v42, 0  ;;  %v263_v44 = vperm.slane %v233_v42, 1  ;;  %v264_v45 = vperm.slane %v233_v42, 2  ;;  %v265_v46 = vperm.slane %v233_v42, 3 }
  0xa4   : > { %v266_v48 = vperm.slane %v233_v42, 4  ;;  %v267_v49 = vperm.slane %v233_v42, 5  ;;  %v268_v50 = vperm.slane %v233_v42, 6  ;;  %v269_v51 = vperm.slane %v233_v42, 7 }
  0xa9   : > { %v285_v26 = vld [vmem:[#allocation1] sm:$0xff] }
  0xaa   : > { %286 = vst [vmem:[#allocation1] ss:$9 sm:$0xff] %v246_v23  ;;  %314 = vperm.xlu2 %593, %v285_v26  }
  0xab   : > { %287 = vst [vmem:[#allocation1 + $0x1] ss:$9 sm:$0xff] %v247_v24 }
  0xac   : > { %288 = vst [vmem:[#allocation1 + $0x2] ss:$9 sm:$0xff] %v248_v25 }
  0xad   : > { %289 = vst [vmem:[#allocation1 + $0x3] ss:$9 sm:$0xff] %v249_v27 }
  0xae   : > { %290 = vst [vmem:[#allocation1 + $0x4] ss:$9 sm:$0xff] %v250_v28 }
  0xaf   : > { %291 = vst [vmem:[#allocation1 + $0x5] ss:$9 sm:$0xff] %v251_v29 }
  0xb0   : > { %292 = vst [vmem:[#allocation1 + $0x6] ss:$9 sm:$0xff] %v252_v30 }
  0xb1   : > { %293 = vst [vmem:[#allocation1 + $0x7] ss:$9 sm:$0xff] %v253_v31 }
  0xb8   : > { %v294_v36 = vld [vmem:[#allocation1] sm:$0xff] }
  0xb9   : > { %295 = vst [vmem:[#allocation1] ss:$9 sm:$0xff] %v254_v33  ;;  %317 = vperm.xlu2 %593, %v294_v36  }
  0xba   : > { %296 = vst [vmem:[#allocation1 + $0x1] ss:$9 sm:$0xff] %v255_v34 }
  0xbb   : > { %297 = vst [vmem:[#allocation1 + $0x2] ss:$9 sm:$0xff] %v256_v35 }
  0xbc   : > { %298 = vst [vmem:[#allocation1 + $0x3] ss:$9 sm:$0xff] %v257_v37 }
  0xbd   : > { %299 = vst [vmem:[#allocation1 + $0x4] ss:$9 sm:$0xff] %v258_v38 }
  0xbe   : > { %300 = vst [vmem:[#allocation1 + $0x5] ss:$9 sm:$0xff] %v259_v39 }
  0xbf   : > { %301 = vst [vmem:[#allocation1 + $0x6] ss:$9 sm:$0xff] %v260_v40 }
  0xc0   : > { %302 = vst [vmem:[#allocation1 + $0x7] ss:$9 sm:$0xff] %v261_v41 }
  0xc7   : > { %v303_v47 = vld [vmem:[#allocation1] sm:$0xff] }
  0xc8   : > { %320 = vperm.xlu0 %594, %v303_v47   ;;  %304 = vst [vmem:[#allocation1] ss:$9 sm:$0xff] %v262_v43 }
  0xc9   : > { %305 = vst [vmem:[#allocation1 + $0x1] ss:$9 sm:$0xff] %v263_v44 }
  0xca   : > { %306 = vst [vmem:[#allocation1 + $0x2] ss:$9 sm:$0xff] %v264_v45 }
  0xcb   : > { %307 = vst [vmem:[#allocation1 + $0x3] ss:$9 sm:$0xff] %v265_v46 }
  0xcc   : > { %308 = vst [vmem:[#allocation1 + $0x4] ss:$9 sm:$0xff] %v266_v48 }
  0xcd   : > { %309 = vst [vmem:[#allocation1 + $0x5] ss:$9 sm:$0xff] %v267_v49 }
  0xce   : > { %310 = vst [vmem:[#allocation1 + $0x6] ss:$9 sm:$0xff] %v268_v50 }
  0xcf   : > { %311 = vst [vmem:[#allocation1 + $0x7] ss:$9 sm:$0xff] %v269_v51 }
  0xd6   : > { %v312_v52 = vld [vmem:[#allocation1] sm:$0xff] }
  0xd7   : > { %323 = vperm.xlu1 %595, %v312_v52  }
 0x104   : > { %v315_v58 = vpop.permute.xlu2 %314 }
 0x105   : > { %v327_v4 = vperm.slane %v315_v58, %v326_v60 }
 0x113   : > { %v318_v62 = vpop.permute.xlu2 %317 }
 0x114   : > { %v329_v1 = vperm.slane %v318_v62, %v328_v61 }
 0x116   : > { %v331_v6 = vsel %vm330_vm1, %v329_v1, %v327_v4 }
 0x13a   : > { %v321_v0 = vpop.permute.xlu0 %320 }
 0x13b   : > { %v333_v3 = vperm.slane %v321_v0, %v332_v63 }
 0x13d   : > { %v335_v9 = vsel %vm334_vm2, %v333_v3, %v331_v6 }
 0x149   : > { %v324_v5 = vpop.permute.xlu1 %323 }
 0x14a   : > { %v337_v8 = vperm.slane %v324_v5, %v336_v2 }
 0x14c   : > { %v339_v10 = vsel %vm338_vm3, %v337_v8, %v335_v9 }
 0x14d   : > { %v341_v11 = vadd.f32 %v339_v10, %v213_v7 }
 0x14f   : > { %343 = vst.msk [vmem:[#allocation2] sm:$0x1] %vm211_vm0, %v341_v11 }
 0x156   : > { %v347_v12 = vld [vmem:[#allocation2] sm:$0x1] }
 0x157   : > { %v348_v13 = vmul.f32 0.00390625, %v347_v12 }
 0x159   : > { %522 = vmatmul.msk.f32.vlgmr.msra.gmra.mxu0 %vm353_vm4, %v348_v13 }
 0x1d6   : > { %v374_v15 = vpop.f32.mrf.mxu0 }
 0x1d7   : > { %v377_v16 = vmax.f32 %v374_v15, 0.0 }
 0x1d9   : > { %523 = vmatmul.msk.f32.vlgmr.msra.gmra.mxu1 %vm379_vm5, %v377_v16 }
 0x256   : > { %v400_v17 = vpop.f32.mrf.mxu1 }
 0x257   : > { %v403_v18 = vsub.f32 0.0, %v400_v17 }
 0x259   : > { %v404_v19 = vmul.f32 1.442695, %v403_v18 }
 0x25b   : > { %596 = vpow2.f32 %v404_v19 }
 0x261   : > { %v597_v20 = vpop.eup %596 }
 0x262   : > { %v406_v21 = vadd.f32 1.0, %v597_v20 }
 0x264   : > { %598 = vrcp.f32 %v406_v21  ;;  %v418_v25 = vand.u32 2147483648, %v406_v21  ;;  %v416_v27 = vand.u32 2147483647, %v406_v21  ;;  %vm412_vm7 = vweird.f32 %v406_v21 }
 0x266   : > { %v419_v29 = vor.u32 1.1754944e-38, %v418_v25  ;;  %vm417_vm9 = vcmp.eq.f32.partialorder %v416_v27, 8.507059e+37 }
 0x26a   : > { %v599_v22 = vpop.eup %598 }
 0x26b   : > { %v408_v23 = vmul.f32 %v599_v22, %v406_v21  ;;  %vm413_vm6 = vweird.f32 %v599_v22 }
 0x26c   : > { %vm414_vm8 = vmor %vm412_vm7, %vm413_vm6 }
 0x26d   : > { %v409_v24 = vsub.f32 1.0, %v408_v23 }
 0x26f   : > { %v410_v26 = vmul.f32 %v599_v22, %v409_v24 }
 0x271   : > { %v411_v28 = vadd.f32 %v599_v22, %v410_v26 }
 0x273   : > { %v415_v30 = vsel %vm414_vm8, %v599_v22, %v411_v28 }
 0x274   : > { %v420_v31 = vsel %vm417_vm9, %v419_v29, %v415_v30 }
 0x275   : > { %422 = vst.msk [vmem:[%s205_s21] sm:$0x1] %vm211_vm0, %v420_v31 }
 0x276   : > { %657 = shalt.err (!%p654_p13)
}
 0x277   : > { %529 = dma.vmem_to_hbm [thread:$0]  (%p789_p9), %s435_s23, 16, %s437_s29, %s424_s15  }
 0x278 PF: > { %s448_s19 = sand.u32 1, %s692_s12   ;;  %p536_p0 = pnand %p516_p12, %p796_p11 }
 0x279   : > { %s449_s7 = scalar_lea.sflag [#allocation5], %s448_s19 }
 0x27a   : > { %p537_p1 = pneg %p536_p0 }
 0x27c   : > { %687 = dma.done.wait (%p537_p1), %s449_s7, 16  }
 0x27d   : > { %689 = vsyncadd (%p537_p1), %s449_s7, 4294967280  ;;  %s19_s17 = sadd.s32 1, %s712_s17   ;;  %s885_s12 = smov %s696_s13 }
 0x27e   : > { %p16_p2 = scmp.ge.s32.totalorder %s19_s17, 4   ;;  %s886_s13 = smov %s700_s14 }
 0x27f   : > { %s887_s14 = smov %s794_s26  ;;  %s888_s15 = smov %s708_s16 }
 0x280   : > { %s889_s16 = smov %s891_s20  ;;  %18 = sbr.rel (!%p16_p2) target bundleno = 6 (0x6), region = 92 }
 0x285   :  { %454 = vsyncpa [#allocation4], 1 }
 0x286   :  { %456 = vsyncpa [#allocation4 + $0x1], 1 }
 0x287   :  { %457 = vsyncpa [#allocation5], 1 }
 0x288   :  { %459 = vsyncpa [#allocation5 + $0x1], 1 }

</bundles_post_ra>
